<compile_context>
chip_gen: v7x
topology: tpu7x:2x2x1
jax: 0.10.0
libtpu: 0.0.40
codegen_flags: <defaults>
</compile_context>

<pallas_src>
import jax
import jax.numpy as jnp
from jax import lax
from jax.experimental import pallas as pl
from jax.experimental.pallas import tpu as pltpu


def _largest_divisor(n, cap):
    for d in range(min(n, cap), 0, -1):
        if n % d == 0:
            return d
    return 1


# ----------------------------------------------------------------------------
# Pallas kernel: one grid step == one (batch block, time block).  The time-block
# axis is sequential ("arbitrary"); h/c persist in VMEM scratch across it.
# ----------------------------------------------------------------------------
def lstm_block_kernel(gx_ref, whh_ref, out_ref, hN_ref, cN_ref, h_sc, c_sc):
    t = pl.program_id(1)                  # time-block index (sequential axis)
    H = h_sc.shape[-1]
    T_blk = out_ref.shape[0]

    @pl.when(t == 0)
    def _init():
        h_sc[...] = jnp.zeros_like(h_sc)
        c_sc[...] = jnp.zeros_like(c_sc)

    # Recurrent weights resident in vregs for the whole block (hoisted out of the loop).
    whh = whh_ref[...]                    # (H, 4H)

    def step(j, carry):
        h, c = carry
        # gates_x (precomputed, f32) + data-dependent h @ W_hh^T  -> (B_blk, 4H)
        gates = gx_ref[j] + jnp.dot(h.astype(whh.dtype), whh,
                                    preferred_element_type=jnp.float32)
        # PyTorch gate order [i, f, g, o].  Static slices; lane-aligned for real H
        # (multiple of 128), sub-vreg but correct for the tiny test H=32.
        i_g = jax.nn.sigmoid(gates[:, 0 * H:1 * H])
        f_g = jax.nn.sigmoid(gates[:, 1 * H:2 * H])
        g_g = jnp.tanh(gates[:, 2 * H:3 * H])
        o_g = jax.nn.sigmoid(gates[:, 3 * H:4 * H])
        c = f_g * c + i_g * g_g
        h = o_g * jnp.tanh(c)
        out_ref[j] = h.astype(out_ref.dtype)
        return (h, c)

    h, c = lax.fori_loop(0, T_blk, step, (h_sc[...], c_sc[...]), unroll=True)
    h_sc[...] = h
    c_sc[...] = c

    # Final states: written only on the last time block (no redundant per-step stores).
    @pl.when(t == pl.num_programs(1) - 1)
    def _final():
        hN_ref[0] = h.astype(hN_ref.dtype)
        cN_ref[0] = c.astype(cN_ref.dtype)


def lstm_pallas(x_tm, w_ih, w_hh, b_ih, b_hh, *,
                t_blk=None, b_blk=None, mxu_dtype=jnp.float32):
    """x_tm: (S, B, E) time-major.  PyTorch weight layout: w_ih (4H, E), w_hh (4H, H)."""
    S, B, E = x_tm.shape
    H = w_hh.shape[1]
    G = 4 * H

    # ---- hoisted input projection: one big MXU matmul over all timesteps ----
    w_ih_t = jnp.transpose(w_ih).astype(mxu_dtype)            # (E, 4H)
    bias = (b_ih + b_hh).astype(jnp.float32)                  # (4H,)
    gx = jnp.dot(x_tm.reshape(S * B, E).astype(mxu_dtype), w_ih_t,
                 preferred_element_type=jnp.float32) + bias
    gx = gx.reshape(S, B, G)                                   # (S, B, 4H) f32

    w_hh_t = jnp.transpose(w_hh).astype(mxu_dtype)            # (H, 4H)

    # ---- block sizes ----
    if t_blk is None:
        t_blk = _largest_divisor(S, 32)
    assert S % t_blk == 0
    nt = S // t_blk
    if b_blk is None or B % b_blk != 0:
        b_blk = B
    nb = B // b_blk

    out_shapes = (
        jax.ShapeDtypeStruct((S, B, H), jnp.float32),   # per-step outputs
        jax.ShapeDtypeStruct((1, B, H), jnp.float32),   # final hidden (num_layers=1)
        jax.ShapeDtypeStruct((1, B, H), jnp.float32),   # final cell
    )

    return pl.pallas_call(
        lstm_block_kernel,
        out_shape=out_shapes,
        grid_spec=pltpu.PrefetchScalarGridSpec(
            num_scalar_prefetch=0,
            grid=(nb, nt),
            in_specs=[
                pl.BlockSpec((t_blk, b_blk, G), lambda b, t: (t, b, 0)),   # gates_x block
                pl.BlockSpec((H, G), lambda b, t: (0, 0)),                 # W_hh^T (resident)
            ],
            out_specs=[
                pl.BlockSpec((t_blk, b_blk, H), lambda b, t: (t, b, 0)),   # outputs block
                pl.BlockSpec((1, b_blk, H), lambda b, t: (0, b, 0)),       # final h (resident over t)
                pl.BlockSpec((1, b_blk, H), lambda b, t: (0, b, 0)),       # final c (resident over t)
            ],
            scratch_shapes=[
                pltpu.VMEM((b_blk, H), jnp.float32),   # h state (persists across time blocks)
                pltpu.VMEM((b_blk, H), jnp.float32),   # c state
            ],
        ),
        compiler_params=pltpu.CompilerParams(
            dimension_semantics=("parallel", "arbitrary")),
    )(gx, w_hh_t)


# ----------------------------------------------------------------------------
# Encoder wrapper (embedding gather + input projection are glue; recurrence is Pallas)
# ----------------------------------------------------------------------------
def lstm_encoder_forward(params, src_tokens, src_lengths, *, mxu_dtype=jnp.float32):
    del src_lengths                                   # unused by the reference forward
    x = params["embed_weight"][src_tokens]            # (B, S, E) embedding lookup
    # F.dropout(p=dropout_in) -> identity in eval mode
    x = jnp.transpose(x, (1, 0, 2))                   # (S, B, E) time-major
    out, h_n, c_n = lstm_pallas(x, params["w_ih"], params["w_hh"],
                                params["b_ih"], params["b_hh"],
                                mxu_dtype=mxu_dtype)
    # F.dropout(p=dropout_out) -> identity in eval mode
    return out, h_n, c_n


# ----------------------------------------------------------------------------
# Pure-JAX reference for correctness check
# ----------------------------------------------------------------------------
def lstm_ref(x_tm, w_ih, w_hh, b_ih, b_hh):
    S, B, E = x_tm.shape
    H = w_hh.shape[1]

    def step(carry, x_t):
        h, c = carry
        gates = x_t @ w_ih.T + b_ih + h @ w_hh.T + b_hh
        i_g = jax.nn.sigmoid(gates[:, 0 * H:1 * H])
        f_g = jax.nn.sigmoid(gates[:, 1 * H:2 * H])
        g_g = jnp.tanh(gates[:, 2 * H:3 * H])
        o_g = jax.nn.sigmoid(gates[:, 3 * H:4 * H])
        c = f_g * c + i_g * g_g
        h = o_g * jnp.tanh(c)
        return (h, c), h

    h0 = jnp.zeros((B, H), jnp.float32)
    c0 = jnp.zeros((B, H), jnp.float32)
    (h_n, c_n), outs = lax.scan(step, (h0, c0), x_tm)
    return outs, h_n[None], c_n[None]


if __name__ == "__main__":
    # Small, module-consistent shapes
    vocab = 16          # len(dictionary)
    embed_dim = 32      # hidden size == embed_dim (LSTM(input=embed, hidden=embed))
    bsz, seqlen = 2, 8

    key = jax.random.PRNGKey(0)
    k_emb, k_wih, k_whh, k_bih, k_bhh, k_tok = jax.random.split(key, 6)

    params = {
        "embed_weight": jax.random.uniform(k_emb, (vocab, embed_dim),
                                           jnp.float32, -0.1, 0.1),
        "w_ih": jax.random.uniform(k_wih, (4 * embed_dim, embed_dim),
                                   jnp.float32, -0.1, 0.1),
        "w_hh": jax.random.uniform(k_whh, (4 * embed_dim, embed_dim),
                                   jnp.float32, -0.1, 0.1),
        "b_ih": jax.random.uniform(k_bih, (4 * embed_dim,),
                                   jnp.float32, -0.1, 0.1),
        "b_hh": jax.random.uniform(k_bhh, (4 * embed_dim,),
                                   jnp.float32, -0.1, 0.1),
    }

    src_tokens = jax.random.randint(k_tok, (bsz, seqlen), 0, vocab, jnp.int32)
    src_lengths = jnp.full((bsz,), seqlen, jnp.int32)

    out, h_n, c_n = lstm_encoder_forward(params, src_tokens, src_lengths)
    out = jax.block_until_ready(out)
    h_n = jax.block_until_ready(h_n)
    c_n = jax.block_until_ready(c_n)

    # correctness check vs pure-JAX reference (f32 path -> tight tolerance)
    x_emb = jnp.transpose(params["embed_weight"][src_tokens], (1, 0, 2))
    out_r, h_r, c_r = lstm_ref(x_emb, params["w_ih"], params["w_hh"],
                               params["b_ih"], params["b_hh"])
    assert out.shape == (seqlen, bsz, embed_dim)
    assert h_n.shape == (1, bsz, embed_dim)
    assert c_n.shape == (1, bsz, embed_dim)
    assert jnp.allclose(out, out_r, atol=1e-5), "output mismatch"
    assert jnp.allclose(h_n, h_r, atol=1e-5), "final hidden mismatch"
    assert jnp.allclose(c_n, c_r, atol=1e-5), "final cell mismatch"

    print("KERNEL_OK")
</pallas_src>

<mosaic_0001>
module attributes {stable_mosaic.version = 11 : i64} {
  func.func @lstm_block_kernel(%arg0: i32, %arg1: i32, %arg2: memref<8x2x128xf32, #tpu.memory_space<vmem>>, %arg3: memref<32x128xf32, #tpu.memory_space<vmem>>, %arg4: memref<8x2x32xf32, #tpu.memory_space<vmem>>, %arg5: memref<1x2x32xf32, #tpu.memory_space<vmem>>, %arg6: memref<1x2x32xf32, #tpu.memory_space<vmem>>, %arg7: memref<2x32xf32, #tpu.memory_space<vmem>>, %arg8: memref<2x32xf32, #tpu.memory_space<vmem>>) attributes {dimension_semantics = [#tpu.dimension_semantics<parallel>, #tpu.dimension_semantics<arbitrary>], iteration_bounds = array<i64: 1, 1>, scalar_prefetch = 0 : i64, scratch_operands = 2 : i64, tpu.core_type = #tpu.core_type<tc>, window_params = [{transform_indices = @transform_0, window_bounds = array<i64: 8, 2, 128>}, {pipeline_mode = #tpu.pipeline_mode<synchronous>, transform_indices = @transform_1, window_bounds = array<i64: 32, 128>}, {transform_indices = @transform_2, window_bounds = array<i64: 8, 2, 32>}, {transform_indices = @transform_3, window_bounds = array<i64: 1, 2, 32>}, {transform_indices = @transform_4, window_bounds = array<i64: 1, 2, 32>}]} {
    %c0_i32 = arith.constant 0 : i32
    %0 = arith.cmpi eq, %arg1, %c0_i32 : i32
    %1 = arith.extui %0 : i1 to i32
    %c0_i32_0 = arith.constant 0 : i32
    %2 = arith.cmpi ne, %1, %c0_i32_0 : i32
    scf.if %2 {
      %cst_76 = arith.constant 0.000000e+00 : f32
      %283 = vector.broadcast %cst_76 : f32 to vector<2x32xf32>
      %c0_77 = arith.constant 0 : index
      %c0_78 = arith.constant 0 : index
      %284 = vector.load %arg7[%c0_77, %c0_78] : memref<2x32xf32, #tpu.memory_space<vmem>>, vector<2x32xf32>
      tpu.vector_store %arg7[%c0_77, %c0_78], %283 {strides = array<i32>} : memref<2x32xf32, #tpu.memory_space<vmem>>, vector<2x32xf32>,
      %cst_79 = arith.constant 0.000000e+00 : f32
      %285 = vector.broadcast %cst_79 : f32 to vector<2x32xf32>
      %c0_80 = arith.constant 0 : index
      %c0_81 = arith.constant 0 : index
      %286 = vector.load %arg8[%c0_80, %c0_81] : memref<2x32xf32, #tpu.memory_space<vmem>>, vector<2x32xf32>
      tpu.vector_store %arg8[%c0_80, %c0_81], %285 {strides = array<i32>} : memref<2x32xf32, #tpu.memory_space<vmem>>, vector<2x32xf32>,
    } else {
    }
    %c0 = arith.constant 0 : index
    %c0_1 = arith.constant 0 : index
    %3 = vector.load %arg3[%c0, %c0_1] : memref<32x128xf32, #tpu.memory_space<vmem>>, vector<32x128xf32>
    %c0_2 = arith.constant 0 : index
    %c0_3 = arith.constant 0 : index
    %4 = vector.load %arg7[%c0_2, %c0_3] : memref<2x32xf32, #tpu.memory_space<vmem>>, vector<2x32xf32>
    %c0_4 = arith.constant 0 : index
    %c0_5 = arith.constant 0 : index
    %5 = vector.load %arg8[%c0_4, %c0_5] : memref<2x32xf32, #tpu.memory_space<vmem>>, vector<2x32xf32>
    %c0_i32_6 = arith.constant 0 : i32
    %6 = arith.index_cast %c0_i32_6 : i32 to index
    %c0_7 = arith.constant 0 : index
    %c0_8 = arith.constant 0 : index
    %7 = vector.load %arg2[%6, %c0_7, %c0_8] : memref<8x2x128xf32, #tpu.memory_space<vmem>>, vector<1x2x128xf32>
    %8 = vector.shape_cast %7 : vector<1x2x128xf32> to vector<2x128xf32>
    %cst = arith.constant dense<0.000000e+00> : vector<2x128xf32>
    %9 = tpu.matmul %4, %3, %cst {dimension_numbers = #tpu.dot_dimension_numbers<[1], [0], [0], [1], [0, 0, 1, 1], [], []>} : vector<2x32xf32>, vector<32x128xf32>, vector<2x128xf32> -> vector<2x128xf32>
    %10 = arith.addf %8, %9 : vector<2x128xf32>
    %11 = vector.extract_strided_slice %10 {offsets = [0, 0], sizes = [2, 32], strides = [1, 1]} : vector<2x128xf32> to vector<2x32xf32>
    %12 = arith.negf %11 : vector<2x32xf32>
    %13 = math.exp %12 : vector<2x32xf32>
    %cst_9 = arith.constant 1.000000e+00 : f32
    %14 = vector.broadcast %cst_9 : f32 to vector<2x32xf32>
    %15 = arith.addf %14, %13 : vector<2x32xf32>
    %16 = arith.divf %14, %15 : vector<2x32xf32>
    %17 = vector.extract_strided_slice %10 {offsets = [0, 32], sizes = [2, 32], strides = [1, 1]} : vector<2x128xf32> to vector<2x32xf32>
    %18 = arith.negf %17 : vector<2x32xf32>
    %19 = math.exp %18 : vector<2x32xf32>
    %cst_10 = arith.constant 1.000000e+00 : f32
    %20 = vector.broadcast %cst_10 : f32 to vector<2x32xf32>
    %21 = arith.addf %20, %19 : vector<2x32xf32>
    %22 = arith.divf %20, %21 : vector<2x32xf32>
    %23 = vector.extract_strided_slice %10 {offsets = [0, 64], sizes = [2, 32], strides = [1, 1]} : vector<2x128xf32> to vector<2x32xf32>
    %24 = math.tanh %23 : vector<2x32xf32>
    %25 = vector.extract_strided_slice %10 {offsets = [0, 96], sizes = [2, 32], strides = [1, 1]} : vector<2x128xf32> to vector<2x32xf32>
    %26 = arith.negf %25 : vector<2x32xf32>
    %27 = math.exp %26 : vector<2x32xf32>
    %cst_11 = arith.constant 1.000000e+00 : f32
    %28 = vector.broadcast %cst_11 : f32 to vector<2x32xf32>
    %29 = arith.addf %28, %27 : vector<2x32xf32>
    %30 = arith.divf %28, %29 : vector<2x32xf32>
    %31 = arith.mulf %22, %5 : vector<2x32xf32>
    %32 = arith.mulf %16, %24 : vector<2x32xf32>
    %33 = arith.addf %31, %32 : vector<2x32xf32>
    %34 = math.tanh %33 : vector<2x32xf32>
    %35 = arith.mulf %30, %34 : vector<2x32xf32>
    %36 = arith.index_cast %c0_i32_6 : i32 to index
    %c0_12 = arith.constant 0 : index
    %c0_13 = arith.constant 0 : index
    %37 = vector.load %arg4[%36, %c0_12, %c0_13] : memref<8x2x32xf32, #tpu.memory_space<vmem>>, vector<1x2x32xf32>
    %38 = vector.shape_cast %37 : vector<1x2x32xf32> to vector<2x32xf32>
    %39 = vector.shape_cast %35 : vector<2x32xf32> to vector<1x2x32xf32>
    tpu.vector_store %arg4[%36, %c0_12, %c0_13], %39 {strides = array<i32>} : memref<8x2x32xf32, #tpu.memory_space<vmem>>, vector<1x2x32xf32>,
    %c1_i32 = arith.constant 1 : i32
    %40 = arith.index_cast %c1_i32 : i32 to index
    %c0_14 = arith.constant 0 : index
    %c0_15 = arith.constant 0 : index
    %41 = vector.load %arg2[%40, %c0_14, %c0_15] : memref<8x2x128xf32, #tpu.memory_space<vmem>>, vector<1x2x128xf32>
    %42 = vector.shape_cast %41 : vector<1x2x128xf32> to vector<2x128xf32>
    %cst_16 = arith.constant dense<0.000000e+00> : vector<2x128xf32>
    %43 = tpu.matmul %35, %3, %cst_16 {dimension_numbers = #tpu.dot_dimension_numbers<[1], [0], [0], [1], [0, 0, 1, 1], [], []>} : vector<2x32xf32>, vector<32x128xf32>, vector<2x128xf32> -> vector<2x128xf32>
    %44 = arith.addf %42, %43 : vector<2x128xf32>
    %45 = vector.extract_strided_slice %44 {offsets = [0, 0], sizes = [2, 32], strides = [1, 1]} : vector<2x128xf32> to vector<2x32xf32>
    %46 = arith.negf %45 : vector<2x32xf32>
    %47 = math.exp %46 : vector<2x32xf32>
    %cst_17 = arith.constant 1.000000e+00 : f32
    %48 = vector.broadcast %cst_17 : f32 to vector<2x32xf32>
    %49 = arith.addf %48, %47 : vector<2x32xf32>
    %50 = arith.divf %48, %49 : vector<2x32xf32>
    %51 = vector.extract_strided_slice %44 {offsets = [0, 32], sizes = [2, 32], strides = [1, 1]} : vector<2x128xf32> to vector<2x32xf32>
    %52 = arith.negf %51 : vector<2x32xf32>
    %53 = math.exp %52 : vector<2x32xf32>
    %cst_18 = arith.constant 1.000000e+00 : f32
    %54 = vector.broadcast %cst_18 : f32 to vector<2x32xf32>
    %55 = arith.addf %54, %53 : vector<2x32xf32>
    %56 = arith.divf %54, %55 : vector<2x32xf32>
    %57 = vector.extract_strided_slice %44 {offsets = [0, 64], sizes = [2, 32], strides = [1, 1]} : vector<2x128xf32> to vector<2x32xf32>
    %58 = math.tanh %57 : vector<2x32xf32>
    %59 = vector.extract_strided_slice %44 {offsets = [0, 96], sizes = [2, 32], strides = [1, 1]} : vector<2x128xf32> to vector<2x32xf32>
    %60 = arith.negf %59 : vector<2x32xf32>
    %61 = math.exp %60 : vector<2x32xf32>
    %cst_19 = arith.constant 1.000000e+00 : f32
    %62 = vector.broadcast %cst_19 : f32 to vector<2x32xf32>
    %63 = arith.addf %62, %61 : vector<2x32xf32>
    %64 = arith.divf %62, %63 : vector<2x32xf32>
    %65 = arith.mulf %56, %33 : vector<2x32xf32>
    %66 = arith.mulf %50, %58 : vector<2x32xf32>
    %67 = arith.addf %65, %66 : vector<2x32xf32>
    %68 = math.tanh %67 : vector<2x32xf32>
    %69 = arith.mulf %64, %68 : vector<2x32xf32>
    %70 = arith.index_cast %c1_i32 : i32 to index
    %c0_20 = arith.constant 0 : index
    %c0_21 = arith.constant 0 : index
    %71 = vector.load %arg4[%70, %c0_20, %c0_21] : memref<8x2x32xf32, #tpu.memory_space<vmem>>, vector<1x2x32xf32>
    %72 = vector.shape_cast %71 : vector<1x2x32xf32> to vector<2x32xf32>
    %73 = vector.shape_cast %69 : vector<2x32xf32> to vector<1x2x32xf32>
    tpu.vector_store %arg4[%70, %c0_20, %c0_21], %73 {strides = array<i32>} : memref<8x2x32xf32, #tpu.memory_space<vmem>>, vector<1x2x32xf32>,
    %c2_i32 = arith.constant 2 : i32
    %74 = arith.index_cast %c2_i32 : i32 to index
    %c0_22 = arith.constant 0 : index
    %c0_23 = arith.constant 0 : index
    %75 = vector.load %arg2[%74, %c0_22, %c0_23] : memref<8x2x128xf32, #tpu.memory_space<vmem>>, vector<1x2x128xf32>
    %76 = vector.shape_cast %75 : vector<1x2x128xf32> to vector<2x128xf32>
    %cst_24 = arith.constant dense<0.000000e+00> : vector<2x128xf32>
    %77 = tpu.matmul %69, %3, %cst_24 {dimension_numbers = #tpu.dot_dimension_numbers<[1], [0], [0], [1], [0, 0, 1, 1], [], []>} : vector<2x32xf32>, vector<32x128xf32>, vector<2x128xf32> -> vector<2x128xf32>
    %78 = arith.addf %76, %77 : vector<2x128xf32>
    %79 = vector.extract_strided_slice %78 {offsets = [0, 0], sizes = [2, 32], strides = [1, 1]} : vector<2x128xf32> to vector<2x32xf32>
    %80 = arith.negf %79 : vector<2x32xf32>
    %81 = math.exp %80 : vector<2x32xf32>
    %cst_25 = arith.constant 1.000000e+00 : f32
    %82 = vector.broadcast %cst_25 : f32 to vector<2x32xf32>
    %83 = arith.addf %82, %81 : vector<2x32xf32>
    %84 = arith.divf %82, %83 : vector<2x32xf32>
    %85 = vector.extract_strided_slice %78 {offsets = [0, 32], sizes = [2, 32], strides = [1, 1]} : vector<2x128xf32> to vector<2x32xf32>
    %86 = arith.negf %85 : vector<2x32xf32>
    %87 = math.exp %86 : vector<2x32xf32>
    %cst_26 = arith.constant 1.000000e+00 : f32
    %88 = vector.broadcast %cst_26 : f32 to vector<2x32xf32>
    %89 = arith.addf %88, %87 : vector<2x32xf32>
    %90 = arith.divf %88, %89 : vector<2x32xf32>
    %91 = vector.extract_strided_slice %78 {offsets = [0, 64], sizes = [2, 32], strides = [1, 1]} : vector<2x128xf32> to vector<2x32xf32>
    %92 = math.tanh %91 : vector<2x32xf32>
    %93 = vector.extract_strided_slice %78 {offsets = [0, 96], sizes = [2, 32], strides = [1, 1]} : vector<2x128xf32> to vector<2x32xf32>
    %94 = arith.negf %93 : vector<2x32xf32>
    %95 = math.exp %94 : vector<2x32xf32>
    %cst_27 = arith.constant 1.000000e+00 : f32
    %96 = vector.broadcast %cst_27 : f32 to vector<2x32xf32>
    %97 = arith.addf %96, %95 : vector<2x32xf32>
    %98 = arith.divf %96, %97 : vector<2x32xf32>
    %99 = arith.mulf %90, %67 : vector<2x32xf32>
    %100 = arith.mulf %84, %92 : vector<2x32xf32>
    %101 = arith.addf %99, %100 : vector<2x32xf32>
    %102 = math.tanh %101 : vector<2x32xf32>
    %103 = arith.mulf %98, %102 : vector<2x32xf32>
    %104 = arith.index_cast %c2_i32 : i32 to index
    %c0_28 = arith.constant 0 : index
    %c0_29 = arith.constant 0 : index
    %105 = vector.load %arg4[%104, %c0_28, %c0_29] : memref<8x2x32xf32, #tpu.memory_space<vmem>>, vector<1x2x32xf32>
    %106 = vector.shape_cast %105 : vector<1x2x32xf32> to vector<2x32xf32>
    %107 = vector.shape_cast %103 : vector<2x32xf32> to vector<1x2x32xf32>
    tpu.vector_store %arg4[%104, %c0_28, %c0_29], %107 {strides = array<i32>} : memref<8x2x32xf32, #tpu.memory_space<vmem>>, vector<1x2x32xf32>,
    %c3_i32 = arith.constant 3 : i32
    %108 = arith.index_cast %c3_i32 : i32 to index
    %c0_30 = arith.constant 0 : index
    %c0_31 = arith.constant 0 : index
    %109 = vector.load %arg2[%108, %c0_30, %c0_31] : memref<8x2x128xf32, #tpu.memory_space<vmem>>, vector<1x2x128xf32>
    %110 = vector.shape_cast %109 : vector<1x2x128xf32> to vector<2x128xf32>
    %cst_32 = arith.constant dense<0.000000e+00> : vector<2x128xf32>
    %111 = tpu.matmul %103, %3, %cst_32 {dimension_numbers = #tpu.dot_dimension_numbers<[1], [0], [0], [1], [0, 0, 1, 1], [], []>} : vector<2x32xf32>, vector<32x128xf32>, vector<2x128xf32> -> vector<2x128xf32>
    %112 = arith.addf %110, %111 : vector<2x128xf32>
    %113 = vector.extract_strided_slice %112 {offsets = [0, 0], sizes = [2, 32], strides = [1, 1]} : vector<2x128xf32> to vector<2x32xf32>
    %114 = arith.negf %113 : vector<2x32xf32>
    %115 = math.exp %114 : vector<2x32xf32>
    %cst_33 = arith.constant 1.000000e+00 : f32
    %116 = vector.broadcast %cst_33 : f32 to vector<2x32xf32>
    %117 = arith.addf %116, %115 : vector<2x32xf32>
    %118 = arith.divf %116, %117 : vector<2x32xf32>
    %119 = vector.extract_strided_slice %112 {offsets = [0, 32], sizes = [2, 32], strides = [1, 1]} : vector<2x128xf32> to vector<2x32xf32>
    %120 = arith.negf %119 : vector<2x32xf32>
    %121 = math.exp %120 : vector<2x32xf32>
    %cst_34 = arith.constant 1.000000e+00 : f32
    %122 = vector.broadcast %cst_34 : f32 to vector<2x32xf32>
    %123 = arith.addf %122, %121 : vector<2x32xf32>
    %124 = arith.divf %122, %123 : vector<2x32xf32>
    %125 = vector.extract_strided_slice %112 {offsets = [0, 64], sizes = [2, 32], strides = [1, 1]} : vector<2x128xf32> to vector<2x32xf32>
    %126 = math.tanh %125 : vector<2x32xf32>
    %127 = vector.extract_strided_slice %112 {offsets = [0, 96], sizes = [2, 32], strides = [1, 1]} : vector<2x128xf32> to vector<2x32xf32>
    %128 = arith.negf %127 : vector<2x32xf32>
    %129 = math.exp %128 : vector<2x32xf32>
    %cst_35 = arith.constant 1.000000e+00 : f32
    %130 = vector.broadcast %cst_35 : f32 to vector<2x32xf32>
    %131 = arith.addf %130, %129 : vector<2x32xf32>
    %132 = arith.divf %130, %131 : vector<2x32xf32>
    %133 = arith.mulf %124, %101 : vector<2x32xf32>
    %134 = arith.mulf %118, %126 : vector<2x32xf32>
    %135 = arith.addf %133, %134 : vector<2x32xf32>
    %136 = math.tanh %135 : vector<2x32xf32>
    %137 = arith.mulf %132, %136 : vector<2x32xf32>
    %138 = arith.index_cast %c3_i32 : i32 to index
    %c0_36 = arith.constant 0 : index
    %c0_37 = arith.constant 0 : index
    %139 = vector.load %arg4[%138, %c0_36, %c0_37] : memref<8x2x32xf32, #tpu.memory_space<vmem>>, vector<1x2x32xf32>
    %140 = vector.shape_cast %139 : vector<1x2x32xf32> to vector<2x32xf32>
    %141 = vector.shape_cast %137 : vector<2x32xf32> to vector<1x2x32xf32>
    tpu.vector_store %arg4[%138, %c0_36, %c0_37], %141 {strides = array<i32>} : memref<8x2x32xf32, #tpu.memory_space<vmem>>, vector<1x2x32xf32>,
    %c4_i32 = arith.constant 4 : i32
    %142 = arith.index_cast %c4_i32 : i32 to index
    %c0_38 = arith.constant 0 : index
    %c0_39 = arith.constant 0 : index
    %143 = vector.load %arg2[%142, %c0_38, %c0_39] : memref<8x2x128xf32, #tpu.memory_space<vmem>>, vector<1x2x128xf32>
    %144 = vector.shape_cast %143 : vector<1x2x128xf32> to vector<2x128xf32>
    %cst_40 = arith.constant dense<0.000000e+00> : vector<2x128xf32>
    %145 = tpu.matmul %137, %3, %cst_40 {dimension_numbers = #tpu.dot_dimension_numbers<[1], [0], [0], [1], [0, 0, 1, 1], [], []>} : vector<2x32xf32>, vector<32x128xf32>, vector<2x128xf32> -> vector<2x128xf32>
    %146 = arith.addf %144, %145 : vector<2x128xf32>
    %147 = vector.extract_strided_slice %146 {offsets = [0, 0], sizes = [2, 32], strides = [1, 1]} : vector<2x128xf32> to vector<2x32xf32>
    %148 = arith.negf %147 : vector<2x32xf32>
    %149 = math.exp %148 : vector<2x32xf32>
    %cst_41 = arith.constant 1.000000e+00 : f32
    %150 = vector.broadcast %cst_41 : f32 to vector<2x32xf32>
    %151 = arith.addf %150, %149 : vector<2x32xf32>
    %152 = arith.divf %150, %151 : vector<2x32xf32>
    %153 = vector.extract_strided_slice %146 {offsets = [0, 32], sizes = [2, 32], strides = [1, 1]} : vector<2x128xf32> to vector<2x32xf32>
    %154 = arith.negf %153 : vector<2x32xf32>
    %155 = math.exp %154 : vector<2x32xf32>
    %cst_42 = arith.constant 1.000000e+00 : f32
    %156 = vector.broadcast %cst_42 : f32 to vector<2x32xf32>
    %157 = arith.addf %156, %155 : vector<2x32xf32>
    %158 = arith.divf %156, %157 : vector<2x32xf32>
    %159 = vector.extract_strided_slice %146 {offsets = [0, 64], sizes = [2, 32], strides = [1, 1]} : vector<2x128xf32> to vector<2x32xf32>
    %160 = math.tanh %159 : vector<2x32xf32>
    %161 = vector.extract_strided_slice %146 {offsets = [0, 96], sizes = [2, 32], strides = [1, 1]} : vector<2x128xf32> to vector<2x32xf32>
    %162 = arith.negf %161 : vector<2x32xf32>
    %163 = math.exp %162 : vector<2x32xf32>
    %cst_43 = arith.constant 1.000000e+00 : f32
    %164 = vector.broadcast %cst_43 : f32 to vector<2x32xf32>
    %165 = arith.addf %164, %163 : vector<2x32xf32>
    %166 = arith.divf %164, %165 : vector<2x32xf32>
    %167 = arith.mulf %158, %135 : vector<2x32xf32>
    %168 = arith.mulf %152, %160 : vector<2x32xf32>
    %169 = arith.addf %167, %168 : vector<2x32xf32>
    %170 = math.tanh %169 : vector<2x32xf32>
    %171 = arith.mulf %166, %170 : vector<2x32xf32>
    %172 = arith.index_cast %c4_i32 : i32 to index
    %c0_44 = arith.constant 0 : index
    %c0_45 = arith.constant 0 : index
    %173 = vector.load %arg4[%172, %c0_44, %c0_45] : memref<8x2x32xf32, #tpu.memory_space<vmem>>, vector<1x2x32xf32>
    %174 = vector.shape_cast %173 : vector<1x2x32xf32> to vector<2x32xf32>
    %175 = vector.shape_cast %171 : vector<2x32xf32> to vector<1x2x32xf32>
    tpu.vector_store %arg4[%172, %c0_44, %c0_45], %175 {strides = array<i32>} : memref<8x2x32xf32, #tpu.memory_space<vmem>>, vector<1x2x32xf32>,
    %c5_i32 = arith.constant 5 : i32
    %176 = arith.index_cast %c5_i32 : i32 to index
    %c0_46 = arith.constant 0 : index
    %c0_47 = arith.constant 0 : index
    %177 = vector.load %arg2[%176, %c0_46, %c0_47] : memref<8x2x128xf32, #tpu.memory_space<vmem>>, vector<1x2x128xf32>
    %178 = vector.shape_cast %177 : vector<1x2x128xf32> to vector<2x128xf32>
    %cst_48 = arith.constant dense<0.000000e+00> : vector<2x128xf32>
    %179 = tpu.matmul %171, %3, %cst_48 {dimension_numbers = #tpu.dot_dimension_numbers<[1], [0], [0], [1], [0, 0, 1, 1], [], []>} : vector<2x32xf32>, vector<32x128xf32>, vector<2x128xf32> -> vector<2x128xf32>
    %180 = arith.addf %178, %179 : vector<2x128xf32>
    %181 = vector.extract_strided_slice %180 {offsets = [0, 0], sizes = [2, 32], strides = [1, 1]} : vector<2x128xf32> to vector<2x32xf32>
    %182 = arith.negf %181 : vector<2x32xf32>
    %183 = math.exp %182 : vector<2x32xf32>
    %cst_49 = arith.constant 1.000000e+00 : f32
    %184 = vector.broadcast %cst_49 : f32 to vector<2x32xf32>
    %185 = arith.addf %184, %183 : vector<2x32xf32>
    %186 = arith.divf %184, %185 : vector<2x32xf32>
    %187 = vector.extract_strided_slice %180 {offsets = [0, 32], sizes = [2, 32], strides = [1, 1]} : vector<2x128xf32> to vector<2x32xf32>
    %188 = arith.negf %187 : vector<2x32xf32>
    %189 = math.exp %188 : vector<2x32xf32>
    %cst_50 = arith.constant 1.000000e+00 : f32
    %190 = vector.broadcast %cst_50 : f32 to vector<2x32xf32>
    %191 = arith.addf %190, %189 : vector<2x32xf32>
    %192 = arith.divf %190, %191 : vector<2x32xf32>
    %193 = vector.extract_strided_slice %180 {offsets = [0, 64], sizes = [2, 32], strides = [1, 1]} : vector<2x128xf32> to vector<2x32xf32>
    %194 = math.tanh %193 : vector<2x32xf32>
    %195 = vector.extract_strided_slice %180 {offsets = [0, 96], sizes = [2, 32], strides = [1, 1]} : vector<2x128xf32> to vector<2x32xf32>
    %196 = arith.negf %195 : vector<2x32xf32>
    %197 = math.exp %196 : vector<2x32xf32>
    %cst_51 = arith.constant 1.000000e+00 : f32
    %198 = vector.broadcast %cst_51 : f32 to vector<2x32xf32>
    %199 = arith.addf %198, %197 : vector<2x32xf32>
    %200 = arith.divf %198, %199 : vector<2x32xf32>
    %201 = arith.mulf %192, %169 : vector<2x32xf32>
    %202 = arith.mulf %186, %194 : vector<2x32xf32>
    %203 = arith.addf %201, %202 : vector<2x32xf32>
    %204 = math.tanh %203 : vector<2x32xf32>
    %205 = arith.mulf %200, %204 : vector<2x32xf32>
    %206 = arith.index_cast %c5_i32 : i32 to index
    %c0_52 = arith.constant 0 : index
    %c0_53 = arith.constant 0 : index
    %207 = vector.load %arg4[%206, %c0_52, %c0_53] : memref<8x2x32xf32, #tpu.memory_space<vmem>>, vector<1x2x32xf32>
    %208 = vector.shape_cast %207 : vector<1x2x32xf32> to vector<2x32xf32>
    %209 = vector.shape_cast %205 : vector<2x32xf32> to vector<1x2x32xf32>
    tpu.vector_store %arg4[%206, %c0_52, %c0_53], %209 {strides = array<i32>} : memref<8x2x32xf32, #tpu.memory_space<vmem>>, vector<1x2x32xf32>,
    %c6_i32 = arith.constant 6 : i32
    %210 = arith.index_cast %c6_i32 : i32 to index
    %c0_54 = arith.constant 0 : index
    %c0_55 = arith.constant 0 : index
    %211 = vector.load %arg2[%210, %c0_54, %c0_55] : memref<8x2x128xf32, #tpu.memory_space<vmem>>, vector<1x2x128xf32>
    %212 = vector.shape_cast %211 : vector<1x2x128xf32> to vector<2x128xf32>
    %cst_56 = arith.constant dense<0.000000e+00> : vector<2x128xf32>
    %213 = tpu.matmul %205, %3, %cst_56 {dimension_numbers = #tpu.dot_dimension_numbers<[1], [0], [0], [1], [0, 0, 1, 1], [], []>} : vector<2x32xf32>, vector<32x128xf32>, vector<2x128xf32> -> vector<2x128xf32>
    %214 = arith.addf %212, %213 : vector<2x128xf32>
    %215 = vector.extract_strided_slice %214 {offsets = [0, 0], sizes = [2, 32], strides = [1, 1]} : vector<2x128xf32> to vector<2x32xf32>
    %216 = arith.negf %215 : vector<2x32xf32>
    %217 = math.exp %216 : vector<2x32xf32>
    %cst_57 = arith.constant 1.000000e+00 : f32
    %218 = vector.broadcast %cst_57 : f32 to vector<2x32xf32>
    %219 = arith.addf %218, %217 : vector<2x32xf32>
    %220 = arith.divf %218, %219 : vector<2x32xf32>
    %221 = vector.extract_strided_slice %214 {offsets = [0, 32], sizes = [2, 32], strides = [1, 1]} : vector<2x128xf32> to vector<2x32xf32>
    %222 = arith.negf %221 : vector<2x32xf32>
    %223 = math.exp %222 : vector<2x32xf32>
    %cst_58 = arith.constant 1.000000e+00 : f32
    %224 = vector.broadcast %cst_58 : f32 to vector<2x32xf32>
    %225 = arith.addf %224, %223 : vector<2x32xf32>
    %226 = arith.divf %224, %225 : vector<2x32xf32>
    %227 = vector.extract_strided_slice %214 {offsets = [0, 64], sizes = [2, 32], strides = [1, 1]} : vector<2x128xf32> to vector<2x32xf32>
    %228 = math.tanh %227 : vector<2x32xf32>
    %229 = vector.extract_strided_slice %214 {offsets = [0, 96], sizes = [2, 32], strides = [1, 1]} : vector<2x128xf32> to vector<2x32xf32>
    %230 = arith.negf %229 : vector<2x32xf32>
    %231 = math.exp %230 : vector<2x32xf32>
    %cst_59 = arith.constant 1.000000e+00 : f32
    %232 = vector.broadcast %cst_59 : f32 to vector<2x32xf32>
    %233 = arith.addf %232, %231 : vector<2x32xf32>
    %234 = arith.divf %232, %233 : vector<2x32xf32>
    %235 = arith.mulf %226, %203 : vector<2x32xf32>
    %236 = arith.mulf %220, %228 : vector<2x32xf32>
    %237 = arith.addf %235, %236 : vector<2x32xf32>
    %238 = math.tanh %237 : vector<2x32xf32>
    %239 = arith.mulf %234, %238 : vector<2x32xf32>
    %240 = arith.index_cast %c6_i32 : i32 to index
    %c0_60 = arith.constant 0 : index
    %c0_61 = arith.constant 0 : index
    %241 = vector.load %arg4[%240, %c0_60, %c0_61] : memref<8x2x32xf32, #tpu.memory_space<vmem>>, vector<1x2x32xf32>
    %242 = vector.shape_cast %241 : vector<1x2x32xf32> to vector<2x32xf32>
    %243 = vector.shape_cast %239 : vector<2x32xf32> to vector<1x2x32xf32>
    tpu.vector_store %arg4[%240, %c0_60, %c0_61], %243 {strides = array<i32>} : memref<8x2x32xf32, #tpu.memory_space<vmem>>, vector<1x2x32xf32>,
    %c7_i32 = arith.constant 7 : i32
    %244 = arith.index_cast %c7_i32 : i32 to index
    %c0_62 = arith.constant 0 : index
    %c0_63 = arith.constant 0 : index
    %245 = vector.load %arg2[%244, %c0_62, %c0_63] : memref<8x2x128xf32, #tpu.memory_space<vmem>>, vector<1x2x128xf32>
    %246 = vector.shape_cast %245 : vector<1x2x128xf32> to vector<2x128xf32>
    %cst_64 = arith.constant dense<0.000000e+00> : vector<2x128xf32>
    %247 = tpu.matmul %239, %3, %cst_64 {dimension_numbers = #tpu.dot_dimension_numbers<[1], [0], [0], [1], [0, 0, 1, 1], [], []>} : vector<2x32xf32>, vector<32x128xf32>, vector<2x128xf32> -> vector<2x128xf32>
    %248 = arith.addf %246, %247 : vector<2x128xf32>
    %249 = vector.extract_strided_slice %248 {offsets = [0, 0], sizes = [2, 32], strides = [1, 1]} : vector<2x128xf32> to vector<2x32xf32>
    %250 = arith.negf %249 : vector<2x32xf32>
    %251 = math.exp %250 : vector<2x32xf32>
    %cst_65 = arith.constant 1.000000e+00 : f32
    %252 = vector.broadcast %cst_65 : f32 to vector<2x32xf32>
    %253 = arith.addf %252, %251 : vector<2x32xf32>
    %254 = arith.divf %252, %253 : vector<2x32xf32>
    %255 = vector.extract_strided_slice %248 {offsets = [0, 32], sizes = [2, 32], strides = [1, 1]} : vector<2x128xf32> to vector<2x32xf32>
    %256 = arith.negf %255 : vector<2x32xf32>
    %257 = math.exp %256 : vector<2x32xf32>
    %cst_66 = arith.constant 1.000000e+00 : f32
    %258 = vector.broadcast %cst_66 : f32 to vector<2x32xf32>
    %259 = arith.addf %258, %257 : vector<2x32xf32>
    %260 = arith.divf %258, %259 : vector<2x32xf32>
    %261 = vector.extract_strided_slice %248 {offsets = [0, 64], sizes = [2, 32], strides = [1, 1]} : vector<2x128xf32> to vector<2x32xf32>
    %262 = math.tanh %261 : vector<2x32xf32>
    %263 = vector.extract_strided_slice %248 {offsets = [0, 96], sizes = [2, 32], strides = [1, 1]} : vector<2x128xf32> to vector<2x32xf32>
    %264 = arith.negf %263 : vector<2x32xf32>
    %265 = math.exp %264 : vector<2x32xf32>
    %cst_67 = arith.constant 1.000000e+00 : f32
    %266 = vector.broadcast %cst_67 : f32 to vector<2x32xf32>
    %267 = arith.addf %266, %265 : vector<2x32xf32>
    %268 = arith.divf %266, %267 : vector<2x32xf32>
    %269 = arith.mulf %260, %237 : vector<2x32xf32>
    %270 = arith.mulf %254, %262 : vector<2x32xf32>
    %271 = arith.addf %269, %270 : vector<2x32xf32>
    %272 = math.tanh %271 : vector<2x32xf32>
    %273 = arith.mulf %268, %272 : vector<2x32xf32>
    %274 = arith.index_cast %c7_i32 : i32 to index
    %c0_68 = arith.constant 0 : index
    %c0_69 = arith.constant 0 : index
    %275 = vector.load %arg4[%274, %c0_68, %c0_69] : memref<8x2x32xf32, #tpu.memory_space<vmem>>, vector<1x2x32xf32>
    %276 = vector.shape_cast %275 : vector<1x2x32xf32> to vector<2x32xf32>
    %277 = vector.shape_cast %273 : vector<2x32xf32> to vector<1x2x32xf32>
    tpu.vector_store %arg4[%274, %c0_68, %c0_69], %277 {strides = array<i32>} : memref<8x2x32xf32, #tpu.memory_space<vmem>>, vector<1x2x32xf32>,
    %c8_i32 = arith.constant 8 : i32
    %c0_70 = arith.constant 0 : index
    %c0_71 = arith.constant 0 : index
    %278 = vector.load %arg7[%c0_70, %c0_71] : memref<2x32xf32, #tpu.memory_space<vmem>>, vector<2x32xf32>
    tpu.vector_store %arg7[%c0_70, %c0_71], %273 {strides = array<i32>} : memref<2x32xf32, #tpu.memory_space<vmem>>, vector<2x32xf32>,
    %c0_72 = arith.constant 0 : index
    %c0_73 = arith.constant 0 : index
    %279 = vector.load %arg8[%c0_72, %c0_73] : memref<2x32xf32, #tpu.memory_space<vmem>>, vector<2x32xf32>
    tpu.vector_store %arg8[%c0_72, %c0_73], %271 {strides = array<i32>} : memref<2x32xf32, #tpu.memory_space<vmem>>, vector<2x32xf32>,
    %c0_i32_74 = arith.constant 0 : i32
    %280 = arith.cmpi eq, %arg1, %c0_i32_74 : i32
    %281 = arith.extui %280 : i1 to i32
    %c0_i32_75 = arith.constant 0 : i32
    %282 = arith.cmpi ne, %281, %c0_i32_75 : i32
    scf.if %282 {
      %c0_76 = arith.constant 0 : index
      %c0_77 = arith.constant 0 : index
      %c0_78 = arith.constant 0 : index
      %283 = vector.load %arg5[%c0_76, %c0_77, %c0_78] : memref<1x2x32xf32, #tpu.memory_space<vmem>>, vector<1x2x32xf32>
      %284 = vector.shape_cast %283 : vector<1x2x32xf32> to vector<2x32xf32>
      %285 = vector.shape_cast %273 : vector<2x32xf32> to vector<1x2x32xf32>
      tpu.vector_store %arg5[%c0_76, %c0_77, %c0_78], %285 {strides = array<i32>} : memref<1x2x32xf32, #tpu.memory_space<vmem>>, vector<1x2x32xf32>,
      %c0_79 = arith.constant 0 : index
      %c0_80 = arith.constant 0 : index
      %c0_81 = arith.constant 0 : index
      %286 = vector.load %arg6[%c0_79, %c0_80, %c0_81] : memref<1x2x32xf32, #tpu.memory_space<vmem>>, vector<1x2x32xf32>
      %287 = vector.shape_cast %286 : vector<1x2x32xf32> to vector<2x32xf32>
      %288 = vector.shape_cast %271 : vector<2x32xf32> to vector<1x2x32xf32>
      tpu.vector_store %arg6[%c0_79, %c0_80, %c0_81], %288 {strides = array<i32>} : memref<1x2x32xf32, #tpu.memory_space<vmem>>, vector<1x2x32xf32>,
    } else {
    }
    return
  }
  func.func @transform_0(%arg0: i32, %arg1: i32) -> (i32, i32, i32) {
    %c0_i32 = arith.constant 0 : i32
    %c0_i32_0 = arith.constant 0 : i32
    return %arg1, %arg0, %c0_i32 : i32, i32, i32
  }
  func.func @transform_1(%arg0: i32, %arg1: i32) -> (i32, i32) {
    %c0_i32 = arith.constant 0 : i32
    %c0_i32_0 = arith.constant 0 : i32
    %c0_i32_1 = arith.constant 0 : i32
    return %c0_i32, %c0_i32_0 : i32, i32
  }
  func.func @transform_2(%arg0: i32, %arg1: i32) -> (i32, i32, i32) {
    %c0_i32 = arith.constant 0 : i32
    %c0_i32_0 = arith.constant 0 : i32
    return %arg1, %arg0, %c0_i32 : i32, i32, i32
  }
  func.func @transform_3(%arg0: i32, %arg1: i32) -> (i32, i32, i32) {
    %c0_i32 = arith.constant 0 : i32
    %c0_i32_0 = arith.constant 0 : i32
    %c0_i32_1 = arith.constant 0 : i32
    return %c0_i32, %arg0, %c0_i32_0 : i32, i32, i32
  }
  func.func @transform_4(%arg0: i32, %arg1: i32) -> (i32, i32, i32) {
    %c0_i32 = arith.constant 0 : i32
    %c0_i32_0 = arith.constant 0 : i32
    %c0_i32_1 = arith.constant 0 : i32
    return %c0_i32, %arg0, %c0_i32_0 : i32, i32, i32
  }
}

</mosaic_0001>

<bundles_post_ra>
// kernel: tpu_custom_call.1
= control target key start
LH: loop header
LB: loop body
LE: loop exit
PB: predicated region body
PF: predicated region fallthrough
CT: control target
= control target key end

     0   :  { %10 = vsyncpa [#allocation5], 0  ;;  %s1574_s0 = inlined_call_operand.hbm [shape: f32[8,2,128], index: 0, kind: input, shape index: {}]   ;;  %s1575_s1 = inlined_call_operand.hbm [shape: f32[32,128], index: 1, kind: input, shape index: {}]   ;;  %s1576_s2 = inlined_call_operand.hbm [shape: f32[8,2,32], index: 2, kind: output, shape index: {0}]   ;;  %s1577_s3 = inlined_call_operand.hbm [shape: f32[1,2,32], index: 3, kind: output, shape index: {1}]   ;;  %s1578_s4 = inlined_call_operand.hbm [shape: f32[1,2,32], index: 4, kind: output, shape index: {2}]  }
   0x1   :  { %11 = vsyncpa [#allocation8], 0 }
   0x2   :  { %12 = vsyncpa [#allocation6], 0 }
   0x3   :  { %13 = vsyncpa [#allocation11], 0  ;;  %s1346_s15 = smov [#allocation4]   ;;  %s1228_s19 = scalar_lea.hbm %s1574_s0, 256 }
   0x4   :  { %s19_s16 = sshll.u32 %s1346_s15, 4  ;;  %p1229_p0 = scmp.ne.s32.totalorder %s1574_s0, %s1228_s19  ;;  %s20_s16 = int_to_ptr.vmem [resolvable:$true] %s19_s16 }
   0x5   :  { %p1232_p1 = scmp.lt.u32.totalorder %s1228_s19, %s1574_s0 }
   0x7   :  { %p1234_p2 = pnand %p1232_p1, %p1229_p0 }
   0x9   :  { %1237 = shalt.err (!%p1234_p2)
}
   0xa   :  { %s1238_s24 = scalar_lea.vmem %s20_s16, 256  ;;  %p1243_p4 = scmp.lt.s32.totalorder %s20_s16, %s20_s16 }
   0xb   :  { %p1239_p3 = scmp.ne.s32.totalorder %s20_s16, %s1238_s24  ;;  %p1244_p5 = scmp.lt.s32.totalorder %s1238_s24, %s1238_s24 }
   0xd   :  { %p1245_p6 = por %p1244_p5, %p1243_p4 }
   0xf   :  { %p1246_p7 = pnand %p1245_p6, %p1239_p3 }
  0x11   :  { %1249 = shalt.err (!%p1246_p7)
}
  0x12   :  { %s1347_s25 = smov 32   ;;  %s1348_s26 = smov 2  }
  0x13   :  { %25 = dma.hbm_to_vmem [thread:$0]  %s1574_s0, 256, %s20_s16, [#allocation5], %s1347_s25, %s1347_s25, %s1348_s26  }
  0x14   :  { %s1349_s29 = smov [#allocation7]   ;;  %s1250_s7 = scalar_lea.hbm %s1575_s1, 512 }
  0x15   :  { %s31_s30 = sshll.u32 %s1349_s29, 4  ;;  %p1251_p8 = scmp.ne.s32.totalorder %s1575_s1, %s1250_s7  ;;  %s32_s30 = int_to_ptr.vmem [resolvable:$true] %s31_s30 }
  0x16   :  { %p1254_p9 = scmp.lt.u32.totalorder %s1250_s7, %s1575_s1 }
  0x18   :  { %p1256_p10 = pnand %p1254_p9, %p1251_p8 }
  0x1a   :  { %1259 = shalt.err (!%p1256_p10)
}
  0x1b   :  { %s1260_s12 = scalar_lea.vmem %s32_s30, 512  ;;  %p1265_p12 = scmp.lt.s32.totalorder %s32_s30, %s32_s30 }
  0x1c   :  { %p1261_p11 = scmp.ne.s32.totalorder %s32_s30, %s1260_s12  ;;  %p1266_p13 = scmp.lt.s32.totalorder %s1260_s12, %s1260_s12 }
  0x1e   :  { %p1267_p0 = por %p1266_p13, %p1265_p12 }
  0x20   :  { %p1268_p1 = pnand %p1267_p0, %p1261_p11 }
  0x22   :  { %1271 = shalt.err (!%p1268_p1)
}
  0x23   :  { %s1350_s0 = smov 128   ;;  %s1351_s13 = smov 8  }
  0x24   :  { %37 = dma.hbm_to_vmem [thread:$0]  %s1575_s1, 512, %s32_s30, [#allocation8], %s1350_s0, %s1350_s0, %s1351_s13  }
  0x25   :  { %1338 = dma.done.wait [#allocation5], 256  }
  0x26   :  { %1339 = vsyncadd [#allocation5], 4294967040 }
  0x27   :  { %1340 = dma.done.wait [#allocation8], 512  }
  0x28   :  { %1341 = vsyncadd [#allocation8], 4294966784  ;;  %vm48_vm0 = vcmask 254976   ;;  %v1352_v0 = vmov 0.0|0.0   ;;  %vm1353_vm1 = vmmov 0   ;;  %v1354_v1 = vmov 0.0  }
  0x29   :  { %1102 = vmatprep.subr.bf16.mxu0 %v1352_v0  ;;  %1022 = vmatprep.mubr.msk.f32.mxu0 %vm1353_vm1, %v1354_v1  ;;  %49 = vst.msk [vmem:[#allocation2] sm:$0x3] %vm48_vm0, %v1354_v1  ;;  %50 = vst.msk [vmem:[#allocation3] sm:$0x3] %vm48_vm0, %v1354_v1  ;;  %v51_v2 = vld [vmem:[#allocation7] sm:$0xff]  ;;  %v52_v3 = vld [vmem:[#allocation7 + $0x8] sm:$0xff] }
  0x2a   :  { %1108 = vmatprep.subr.bf16.mxu1 %v1352_v0  ;;  %1033 = vmatprep.mubr.msk.f32.mxu1 %vm1353_vm1, %v1354_v1  ;;  %v53_v4 = vld [vmem:[#allocation7 + $0x10] sm:$0xff]  ;;  %v1422_v5 = vpack.c.bf16 %v52_v3, %v51_v2  ;;  %v54_v6 = vld [vmem:[#allocation7 + $0x18] sm:$0xff]  ;;  %vm58_vm2 = vcmask 261120   ;;  %s1355_s1 = smov 64   ;;  %s1356_s16 = smov 96  }
  0x2b   :  { %v1425_v7 = vpack.c.bf16 %v54_v6, %v53_v4  ;;  %v57_v9 = vld [vmem:[#allocation4] sm:$0x3]  ;;  %v168_v29 = vld [vmem:[#allocation4 + $0x2] sm:$0x3]  ;;  %v273_v47 = vld [vmem:[#allocation4 + $0x4] sm:$0x3] }
  0x2c   :  { %1104 = vmatpush3.bf16.msra.mxu0 %v1422_v5  ;;  %1110 = vmatpush3.bf16.msra.mxu1 %v1422_v5  ;;  %v378_v3 = vld [vmem:[#allocation4 + $0x6] sm:$0x3]  ;;  %s1357_s17 = smov [#allocation10]   ;;  %s1358_s19 = smov [#allocation9]  }
  0x2d   :  { %1105 = vmatprep.subr.bf16.mxu0 %v1352_v0  ;;  %1111 = vmatprep.subr.bf16.mxu1 %v1352_v0  ;;  %s931_s18 = sshll.u32 %s1357_s17, 4  ;;  %s918_s20 = sshll.u32 %s1358_s19, 4  ;;  %s932_s18 = int_to_ptr.vmem [resolvable:$true] %s931_s18  ;;  %s1518_s20 = int_to_ptr.vmem [resolvable:$true] %s918_s20 }
  0x2e   :  { %s1359_s21 = smov [#allocation12]   ;;  %s1272_s23 = scalar_lea.vmem %s932_s18, 32 }
  0x2f   :  { %s941_s22 = sshll.u32 %s1359_s21, 4  ;;  %p1273_p2 = scmp.ne.s32.totalorder %s932_s18, %s1272_s23  ;;  %s1523_s22 = int_to_ptr.vmem [resolvable:$true] %s941_s22 }
  0x30   :  { %1107 = vmatpush3.bf16.msra.mxu0 %v1425_v7  ;;  %v55_v8 = vld [vmem:[#allocation2] sm:$0x3]  ;;  %1113 = vmatpush3.bf16.msra.mxu1 %v1425_v7  ;;  %v56_v14 = vld [vmem:[#allocation3] sm:$0x3]  ;;  %p1277_p3 = scmp.lt.s32.totalorder %s932_s18, %s932_s18  ;;  %p1278_p4 = scmp.lt.s32.totalorder %s1272_s23, %s1272_s23 }
  0x31   :  { %1114 = vmatprep.subr.bf16.mxu0 %v1352_v0  ;;  %1120 = vmatprep.subr.bf16.mxu1 %v1352_v0 }
  0x32   :  { %p1279_p5 = por %p1278_p4, %p1277_p3 }
  0x33   :  { %1023 = vmatmul.mubr.msk.f32.vlgmr.msra.gmra.mrb[0].mxu0 %vm58_vm2, %v55_v8 }
  0x34   :  { %1116 = vmatpush3.bf16.msra.mxu0 %v1422_v5  ;;  %1044 = vmatprep.mubr.msk.f32.mxu0 %vm1353_vm1, %v1354_v1  ;;  %p1280_p6 = pnand %p1279_p5, %p1273_p2 }
  0x35   :  { %1117 = vmatprep.subr.bf16.mxu0 %v1352_v0 }
  0x38   :  { %1119 = vmatpush3.bf16.msra.mxu0 %v1425_v7 }
  0x39   :  { %1126 = vmatprep.subr.bf16.mxu0 %v1352_v0 }
 0x106   :  { %v128_v10 = vpop.f32.mrb[0].mxu0 }
 0x107   :  { %v132_v11 = vadd.f32 %v128_v10, %v57_v9  ;;  %v1024_v12 = vpop.f32.mrb[1].mxu0 }
 0x109   :  { %1164 = vtanh.f32 %v132_v11  ;;  %v959_v15 = vmul.f32 -1.442695, %v132_v11 }
 0x10b   :  { %1166 = vpow2.f32 %v959_v15 }
 0x113   :  { %v1165_v13 = vpop.eup %1164 }
 0x114   :  { %146 = vrot.lane.b32.xlu0 %v1165_v13, %s1355_s1 }
 0x115   :  { %v1167_v16 = vpop.eup %1166 }
 0x116   :  { %v136_v17 = vadd.f32 1.0, %v1167_v16 }
 0x118   :  { %141 = vrot.lane.b32.xlu0 %v56_v14, %s1347_s25  ;;  %1168 = vrcp.f32 %v136_v17 }
 0x122   :  { %v1169_v18 = vpop.eup %1168 }
 0x186   :  { %v147_v19 = vpop.permute.xlu0 %146 }
 0x187   :  { %v149_v20 = vmul.f32 %v1169_v18, %v147_v19 }
 0x189   :  { %151 = vrot.lane.b32.xlu1 %v149_v20, %s1347_s25 }
 0x18a   :  { %v142_v21 = vpop.permute.xlu0 %141 }
 0x18b   :  { %v144_v22 = vmul.f32 %v1169_v18, %v142_v21 }
 0x1fb   :  { %v152_v23 = vpop.permute.xlu1 %151 }
 0x1fc   :  { %v154_v24 = vadd.f32 %v152_v23, %v144_v22  ;;  %v483_v23 = vld [vmem:[#allocation4 + $0x8] sm:$0x3] }
 0x1fe   :  { %1170 = vtanh.f32 %v154_v24 }
 0x208   :  { %v1171_v25 = vpop.eup %1170 }
 0x209   :  { %157 = vrot.lane.b32.xlu1 %v1171_v25, %s1355_s1 }
 0x27b   :  { %v158_v26 = vpop.permute.xlu1 %157 }
 0x27c   :  { %v160_v27 = vmul.f32 %v1169_v18, %v158_v26 }
 0x27e   :  { %162 = vrot.lane.b32.xlu0 %v160_v27, %s1347_s25 }
 0x2f0   :  { %v163_v28 = vpop.permute.xlu0 %162 }
 0x2f1   :  { %166 = vst.msk [vmem:[#allocation9] sm:$0x3] %vm48_vm0, %v163_v28  ;;  %1034 = vmatmul.mubr.msk.f32.vlgmr.msra.gmra.mrb[0].mxu1 %vm58_vm2, %v163_v28 }
 0x2f2   :  { %1122 = vmatpush3.bf16.msra.mxu1 %v1422_v5  ;;  %1055 = vmatprep.mubr.msk.f32.mxu1 %vm1353_vm1, %v1354_v1 }
 0x2f3   :  { %1123 = vmatprep.subr.bf16.mxu1 %v1352_v0 }
 0x2f6   :  { %1125 = vmatpush3.bf16.msra.mxu1 %v1425_v7 }
 0x2f7   :  { %1132 = vmatprep.subr.bf16.mxu1 %v1352_v0 }
 0x3c4   :  { %v237_v30 = vpop.f32.mrb[0].mxu1 }
 0x3c5   :  { %v241_v31 = vadd.f32 %v237_v30, %v168_v29  ;;  %v1035_v32 = vpop.f32.mrb[1].mxu1 }
 0x3c7   :  { %1172 = vtanh.f32 %v241_v31  ;;  %v961_v34 = vmul.f32 -1.442695, %v241_v31 }
 0x3c9   :  { %1174 = vpow2.f32 %v961_v34 }
 0x3d1   :  { %v1173_v33 = vpop.eup %1172 }
 0x3d2   :  { %251 = vrot.lane.b32.xlu1 %v1173_v33, %s1355_s1 }
 0x3d3   :  { %v1175_v35 = vpop.eup %1174 }
 0x3d4   :  { %v245_v36 = vadd.f32 1.0, %v1175_v35 }
 0x3d6   :  { %1176 = vrcp.f32 %v245_v36 }
 0x3e0   :  { %v1177_v37 = vpop.eup %1176 }
 0x3e1   :  { %v249_v40 = vmul.f32 %v1177_v37, %v154_v24 }
 0x444   :  { %v252_v38 = vpop.permute.xlu1 %251 }
 0x445   :  { %v254_v39 = vmul.f32 %v1177_v37, %v252_v38 }
 0x447   :  { %256 = vrot.lane.b32.xlu0 %v254_v39, %s1347_s25 }
 0x4b9   :  { %v257_v41 = vpop.permute.xlu0 %256 }
 0x4ba   :  { %v259_v42 = vadd.f32 %v257_v41, %v249_v40  ;;  %v588_v41 = vld [vmem:[#allocation4 + $0xa] sm:$0x3] }
 0x4bc   :  { %1178 = vtanh.f32 %v259_v42 }
 0x4c6   :  { %v1179_v43 = vpop.eup %1178 }
 0x4c7   :  { %262 = vrot.lane.b32.xlu1 %v1179_v43, %s1355_s1 }
 0x539   :  { %v263_v44 = vpop.permute.xlu1 %262 }
 0x53a   :  { %v265_v45 = vmul.f32 %v1177_v37, %v263_v44 }
 0x53c   :  { %267 = vrot.lane.b32.xlu0 %v265_v45, %s1347_s25 }
 0x5ae   :  { %v268_v46 = vpop.permute.xlu0 %267 }
 0x5af   :  { %271 = vst.msk [vmem:[#allocation9 + $0x2] sm:$0x3] %vm48_vm0, %v268_v46  ;;  %1045 = vmatmul.mubr.msk.f32.vlgmr.msra.gmra.mrb[2].mxu0 %vm58_vm2, %v268_v46 }
 0x5b0   :  { %1128 = vmatpush3.bf16.msra.mxu0 %v1422_v5  ;;  %1066 = vmatprep.mubr.msk.f32.mxu0 %vm1353_vm1, %v1354_v1 }
 0x5b1   :  { %1129 = vmatprep.subr.bf16.mxu0 %v1352_v0 }
 0x5b4   :  { %1131 = vmatpush3.bf16.msra.mxu0 %v1425_v7 }
 0x5b5   :  { %1138 = vmatprep.subr.bf16.mxu0 %v1352_v0 }
 0x682   :  { %v342_v48 = vpop.f32.mrb[2].mxu0 }
 0x683   :  { %v346_v49 = vadd.f32 %v342_v48, %v273_v47  ;;  %v1046_v50 = vpop.f32.mrb[3].mxu0 }
 0x685   :  { %1180 = vtanh.f32 %v346_v49  ;;  %v963_v52 = vmul.f32 -1.442695, %v346_v49 }
 0x687   :  { %1182 = vpow2.f32 %v963_v52 }
 0x68f   :  { %v1181_v51 = vpop.eup %1180 }
 0x690   :  { %356 = vrot.lane.b32.xlu1 %v1181_v51, %s1355_s1 }
 0x691   :  { %v1183_v53 = vpop.eup %1182 }
 0x692   :  { %v350_v54 = vadd.f32 1.0, %v1183_v53 }
 0x694   :  { %1184 = vrcp.f32 %v350_v54 }
 0x69e   :  { %v1185_v55 = vpop.eup %1184 }
 0x69f   :  { %v354_v58 = vmul.f32 %v1185_v55, %v259_v42 }
 0x702   :  { %v357_v56 = vpop.permute.xlu1 %356 }
 0x703   :  { %v359_v57 = vmul.f32 %v1185_v55, %v357_v56 }
 0x705   :  { %361 = vrot.lane.b32.xlu0 %v359_v57, %s1347_s25 }
 0x777   :  { %v362_v59 = vpop.permute.xlu0 %361 }
 0x778   :  { %v364_v60 = vadd.f32 %v362_v59, %v354_v58 }
 0x77a   :  { %1186 = vtanh.f32 %v364_v60 }
 0x784   :  { %v1187_v61 = vpop.eup %1186 }
 0x785   :  { %367 = vrot.lane.b32.xlu1 %v1187_v61, %s1355_s1 }
 0x7f7   :  { %v368_v62 = vpop.permute.xlu1 %367 }
 0x7f8   :  { %v370_v63 = vmul.f32 %v1185_v55, %v368_v62  ;;  %v693_v55 = vld [vmem:[#allocation4 + $0xc] sm:$0x3] }
 0x7fa   :  { %372 = vrot.lane.b32.xlu0 %v370_v63, %s1347_s25 }
 0x86c   :  { %v373_v2 = vpop.permute.xlu0 %372 }
 0x86d   :  { %376 = vst.msk [vmem:[#allocation9 + $0x4] sm:$0x3] %vm48_vm0, %v373_v2  ;;  %1056 = vmatmul.mubr.msk.f32.vlgmr.msra.gmra.mrb[2].mxu1 %vm58_vm2, %v373_v2 }
 0x86e   :  { %1134 = vmatpush3.bf16.msra.mxu1 %v1422_v5  ;;  %1077 = vmatprep.mubr.msk.f32.mxu1 %vm1353_vm1, %v1354_v1 }
 0x86f   :  { %1135 = vmatprep.subr.bf16.mxu1 %v1352_v0 }
 0x872   :  { %1137 = vmatpush3.bf16.msra.mxu1 %v1425_v7 }
 0x873   :  { %1144 = vmatprep.subr.bf16.mxu1 %v1352_v0 }
 0x940   :  { %v447_v4 = vpop.f32.mrb[2].mxu1 }
 0x941   :  { %v451_v6 = vadd.f32 %v447_v4, %v378_v3  ;;  %v1057_v8 = vpop.f32.mrb[3].mxu1 }
 0x943   :  { %1188 = vtanh.f32 %v451_v6  ;;  %v965_v10 = vmul.f32 -1.442695, %v451_v6 }
 0x945   :  { %1190 = vpow2.f32 %v965_v10 }
 0x94d   :  { %v1189_v9 = vpop.eup %1188 }
 0x94e   :  { %461 = vrot.lane.b32.xlu1 %v1189_v9, %s1355_s1 }
 0x94f   :  { %v1191_v11 = vpop.eup %1190 }
 0x950   :  { %v455_v12 = vadd.f32 1.0, %v1191_v11 }
 0x952   :  { %1192 = vrcp.f32 %v455_v12 }
 0x95c   :  { %v1193_v13 = vpop.eup %1192 }
 0x95d   :  { %v459_v16 = vmul.f32 %v1193_v13, %v364_v60 }
 0x9c0   :  { %v462_v14 = vpop.permute.xlu1 %461 }
 0x9c1   :  { %v464_v15 = vmul.f32 %v1193_v13, %v462_v14 }
 0x9c3   :  { %466 = vrot.lane.b32.xlu0 %v464_v15, %s1347_s25 }
 0xa35   :  { %v467_v17 = vpop.permute.xlu0 %466 }
 0xa36   :  { %v469_v18 = vadd.f32 %v467_v17, %v459_v16 }
 0xa38   :  { %1194 = vtanh.f32 %v469_v18 }
 0xa42   :  { %v1195_v19 = vpop.eup %1194 }
 0xa43   :  { %472 = vrot.lane.b32.xlu1 %v1195_v19, %s1355_s1 }
 0xab5   :  { %v473_v20 = vpop.permute.xlu1 %472 }
 0xab6   :  { %v475_v21 = vmul.f32 %v1193_v13, %v473_v20  ;;  %v798_v13 = vld [vmem:[#allocation4 + $0xe] sm:$0x3] }
 0xab8   :  { %477 = vrot.lane.b32.xlu0 %v475_v21, %s1347_s25 }
 0xb2a   :  { %v478_v22 = vpop.permute.xlu0 %477 }
 0xb2b   :  { %481 = vst.msk [vmem:[#allocation9 + $0x6] sm:$0x3] %vm48_vm0, %v478_v22  ;;  %1067 = vmatmul.mubr.msk.f32.vlgmr.msra.gmra.mrb[4].mxu0 %vm58_vm2, %v478_v22 }
 0xb2c   :  { %1140 = vmatpush3.bf16.msra.mxu0 %v1422_v5  ;;  %1088 = vmatprep.mubr.msk.f32.mxu0 %vm1353_vm1, %v1354_v1 }
 0xb2d   :  { %1141 = vmatprep.subr.bf16.mxu0 %v1352_v0 }
 0xb30   :  { %1143 = vmatpush3.bf16.msra.mxu0 %v1425_v7 }
 0xbfe   :  { %v552_v24 = vpop.f32.mrb[4].mxu0 }
 0xbff   :  { %v556_v25 = vadd.f32 %v552_v24, %v483_v23  ;;  %v1068_v26 = vpop.f32.mrb[5].mxu0 }
 0xc01   :  { %1196 = vtanh.f32 %v556_v25  ;;  %v967_v28 = vmul.f32 -1.442695, %v556_v25 }
 0xc03   :  { %1198 = vpow2.f32 %v967_v28 }
 0xc0b   :  { %v1197_v27 = vpop.eup %1196 }
 0xc0c   :  { %566 = vrot.lane.b32.xlu1 %v1197_v27, %s1355_s1 }
 0xc0d   :  { %v1199_v29 = vpop.eup %1198 }
 0xc0e   :  { %v560_v30 = vadd.f32 1.0, %v1199_v29 }
 0xc10   :  { %1200 = vrcp.f32 %v560_v30 }
 0xc1a   :  { %v1201_v31 = vpop.eup %1200 }
 0xc1b   :  { %v564_v34 = vmul.f32 %v1201_v31, %v469_v18 }
 0xc7e   :  { %v567_v32 = vpop.permute.xlu1 %566 }
 0xc7f   :  { %v569_v33 = vmul.f32 %v1201_v31, %v567_v32 }
 0xc81   :  { %571 = vrot.lane.b32.xlu0 %v569_v33, %s1347_s25 }
 0xcf3   :  { %v572_v35 = vpop.permute.xlu0 %571 }
 0xcf4   :  { %v574_v36 = vadd.f32 %v572_v35, %v564_v34 }
 0xcf6   :  { %1202 = vtanh.f32 %v574_v36 }
 0xd00   :  { %v1203_v37 = vpop.eup %1202 }
 0xd01   :  { %577 = vrot.lane.b32.xlu1 %v1203_v37, %s1355_s1 }
 0xd73   :  { %v578_v38 = vpop.permute.xlu1 %577 }
 0xd74   :  { %v580_v39 = vmul.f32 %v1201_v31, %v578_v38 }
 0xd76   :  { %582 = vrot.lane.b32.xlu0 %v580_v39, %s1347_s25 }
 0xde8   :  { %v583_v40 = vpop.permute.xlu0 %582 }
 0xde9   :  { %586 = vst.msk [vmem:[#allocation9 + $0x8] sm:$0x3] %vm48_vm0, %v583_v40  ;;  %1078 = vmatmul.mubr.msk.f32.vlgmr.msra.gmra.mrb[4].mxu1 %vm58_vm2, %v583_v40 }
 0xdea   :  { %1146 = vmatpush3.bf16.msra.mxu1 %v1422_v5  ;;  %1099 = vmatprep.mubr.msk.f32.mxu1 %vm1353_vm1, %v1354_v1 }
 0xdeb   :  { %1147 = vmatprep.subr.bf16.mxu1 %v1352_v0 }
 0xdee   :  { %1149 = vmatpush3.bf16.msra.mxu1 %v1425_v7 }
 0xebc   :  { %v657_v42 = vpop.f32.mrb[4].mxu1 }
 0xebd   :  { %v661_v43 = vadd.f32 %v657_v42, %v588_v41  ;;  %v1079_v44 = vpop.f32.mrb[5].mxu1 }
 0xebf   :  { %1204 = vtanh.f32 %v661_v43  ;;  %v969_v46 = vmul.f32 -1.442695, %v661_v43 }
 0xec1   :  { %1206 = vpow2.f32 %v969_v46 }
 0xec9   :  { %v1205_v45 = vpop.eup %1204 }
 0xeca   :  { %671 = vrot.lane.b32.xlu1 %v1205_v45, %s1355_s1 }
 0xecb   :  { %v1207_v47 = vpop.eup %1206 }
 0xecc   :  { %v665_v48 = vadd.f32 1.0, %v1207_v47 }
 0xece   :  { %1208 = vrcp.f32 %v665_v48 }
 0xed8   :  { %v1209_v5 = vpop.eup %1208 }
 0xed9   :  { %v669_v0 = vmul.f32 %v1209_v5, %v574_v36 }
 0xf3c   :  { %v672_v49 = vpop.permute.xlu1 %671 }
 0xf3d   :  { %v674_v1 = vmul.f32 %v1209_v5, %v672_v49 }
 0xf3f   :  { %676 = vrot.lane.b32.xlu0 %v674_v1, %s1347_s25 }
 0xfb1   :  { %v677_v7 = vpop.permute.xlu0 %676 }
 0xfb2   :  { %v679_v50 = vadd.f32 %v677_v7, %v669_v0 }
 0xfb4   :  { %1210 = vtanh.f32 %v679_v50 }
 0xfbe   :  { %v1211_v51 = vpop.eup %1210 }
 0xfbf   :  { %682 = vrot.lane.b32.xlu1 %v1211_v51, %s1355_s1 }
0x1031   :  { %v683_v52 = vpop.permute.xlu1 %682 }
0x1032   :  { %v685_v53 = vmul.f32 %v1209_v5, %v683_v52 }
0x1034   :  { %687 = vrot.lane.b32.xlu0 %v685_v53, %s1347_s25 }
0x10a6   :  { %v688_v54 = vpop.permute.xlu0 %687 }
0x10a7   :  { %691 = vst.msk [vmem:[#allocation9 + $0xa] sm:$0x3] %vm48_vm0, %v688_v54  ;;  %1089 = vmatmul.mubr.msk.f32.vlgmr.msra.gmra.mrb[6].mxu0 %vm58_vm2, %v688_v54 }
0x117a   :  { %v762_v56 = vpop.f32.mrb[6].mxu0 }
0x117b   :  { %v766_v57 = vadd.f32 %v762_v56, %v693_v55  ;;  %v1090_v58 = vpop.f32.mrb[7].mxu0 }
0x117d   :  { %1212 = vtanh.f32 %v766_v57  ;;  %v971_v60 = vmul.f32 -1.442695, %v766_v57 }
0x117f   :  { %1214 = vpow2.f32 %v971_v60 }
0x1187   :  { %v1213_v59 = vpop.eup %1212 }
0x1188   :  { %776 = vrot.lane.b32.xlu1 %v1213_v59, %s1355_s1 }
0x1189   :  { %v1215_v61 = vpop.eup %1214 }
0x118a   :  { %v770_v62 = vadd.f32 1.0, %v1215_v61 }
0x118c   :  { %1216 = vrcp.f32 %v770_v62 }
0x1196   :  { %v1217_v63 = vpop.eup %1216 }
0x1197   :  { %v774_v4 = vmul.f32 %v1217_v63, %v679_v50 }
0x11fa   :  { %v777_v2 = vpop.permute.xlu1 %776 }
0x11fb   :  { %v779_v3 = vmul.f32 %v1217_v63, %v777_v2 }
0x11fd   :  { %781 = vrot.lane.b32.xlu0 %v779_v3, %s1347_s25 }
0x126f   :  { %v782_v6 = vpop.permute.xlu0 %781 }
0x1270   :  { %v784_v8 = vadd.f32 %v782_v6, %v774_v4 }
0x1272   :  { %1218 = vtanh.f32 %v784_v8 }
0x127c   :  { %v1219_v9 = vpop.eup %1218 }
0x127d   :  { %787 = vrot.lane.b32.xlu1 %v1219_v9, %s1355_s1 }
0x12ef   :  { %v788_v10 = vpop.permute.xlu1 %787 }
0x12f0   :  { %v790_v11 = vmul.f32 %v1217_v63, %v788_v10 }
0x12f2   :  { %792 = vrot.lane.b32.xlu0 %v790_v11, %s1347_s25 }
0x1364   :  { %v793_v12 = vpop.permute.xlu0 %792 }
0x1365   :  { %796 = vst.msk [vmem:[#allocation9 + $0xc] sm:$0x3] %vm48_vm0, %v793_v12  ;;  %1100 = vmatmul.mubr.msk.f32.vlgmr.msra.gmra.mrb[6].mxu1 %vm58_vm2, %v793_v12 }
0x1438   :  { %v867_v14 = vpop.f32.mrb[6].mxu1 }
0x1439   :  { %v871_v15 = vadd.f32 %v867_v14, %v798_v13  ;;  %v1101_v16 = vpop.f32.mrb[7].mxu1 }
0x143b   :  { %1220 = vtanh.f32 %v871_v15  ;;  %v973_v18 = vmul.f32 -1.442695, %v871_v15 }
0x143d   :  { %1222 = vpow2.f32 %v973_v18 }
0x1445   :  { %v1221_v17 = vpop.eup %1220 }
0x1446   :  { %881 = vrot.lane.b32.xlu1 %v1221_v17, %s1355_s1 }
0x1447   :  { %v1223_v19 = vpop.eup %1222 }
0x1448   :  { %v875_v20 = vadd.f32 1.0, %v1223_v19 }
0x144a   :  { %1224 = vrcp.f32 %v875_v20 }
0x1454   :  { %v1225_v21 = vpop.eup %1224 }
0x1455   :  { %v879_v24 = vmul.f32 %v1225_v21, %v784_v8 }
0x14b8   :  { %v882_v22 = vpop.permute.xlu1 %881 }
0x14b9   :  { %v884_v23 = vmul.f32 %v1225_v21, %v882_v22 }
0x14bb   :  { %886 = vrot.lane.b32.xlu0 %v884_v23, %s1347_s25 }
0x152d   :  { %v887_v25 = vpop.permute.xlu0 %886 }
0x152e   :  { %v889_v26 = vadd.f32 %v887_v25, %v879_v24 }
0x1530   :  { %1226 = vtanh.f32 %v889_v26 }
0x153a   :  { %v1227_v27 = vpop.eup %1226 }
0x153b   :  { %892 = vrot.lane.b32.xlu1 %v1227_v27, %s1355_s1 }
0x153f   :  { %904 = vrot.lane.b32.xlu1 %v889_v26, %s1356_s16 }
0x15ad   :  { %v893_v28 = vpop.permute.xlu1 %892 }
0x15ae   :  { %v895_v29 = vmul.f32 %v1225_v21, %v893_v28 }
0x15b0   :  { %897 = vrot.lane.b32.xlu0 %v895_v29, %s1347_s25 }
0x15b1   :  { %v905_v30 = vpop.permute.xlu1 %904 }
0x15b2   :  { %907 = vst.msk [vmem:[#allocation3] sm:$0x3] %vm48_vm0, %v905_v30  ;;  %912 = vst.msk [vmem:[#allocation12] sm:$0x3] %vm48_vm0, %v905_v30 }
0x1622   :  { %v898_v31 = vpop.permute.xlu0 %897 }
0x1623   :  { %901 = vst.msk [vmem:[#allocation9 + $0xe] sm:$0x3] %vm48_vm0, %v898_v31  ;;  %902 = vst.msk [vmem:[#allocation2] sm:$0x3] %vm48_vm0, %v898_v31 }
0x1624   :  { %911 = vst.msk [vmem:[#allocation10] sm:$0x3] %vm48_vm0, %v898_v31 }
0x1625   :  { %1283 = shalt.err (!%p1280_p6)
}
0x1626   :  { %s1284_s28 = scalar_lea.hbm %s1577_s3, 32 }
0x1627   :  { %p1285_p7 = scmp.ne.s32.totalorder %s1577_s3, %s1284_s28  ;;  %p1288_p8 = scmp.lt.u32.totalorder %s1284_s28, %s1577_s3 }
0x1629   :  { %p1290_p9 = pnand %p1288_p8, %p1285_p7 }
0x162b   :  { %1293 = shalt.err (!%p1290_p9)
}
0x162c   :  { %934 = dma.vmem_to_hbm [thread:$0]  %s932_s18, 32, %s1577_s3, [#allocation11]  }
0x162d   :  { %s1294_s9 = scalar_lea.vmem %s1518_s20, 256  ;;  %p1299_p11 = scmp.lt.s32.totalorder %s1518_s20, %s1518_s20 }
0x162e   :  { %p1295_p10 = scmp.ne.s32.totalorder %s1518_s20, %s1294_s9  ;;  %p1300_p12 = scmp.lt.s32.totalorder %s1294_s9, %s1294_s9 }
0x1630   :  { %p1301_p13 = por %p1300_p12, %p1299_p11 }
0x1632   :  { %p1302_p0 = pnand %p1301_p13, %p1295_p10 }
0x1634   :  { %1305 = shalt.err (!%p1302_p0)
}
0x1635   :  { %s1306_s12 = scalar_lea.hbm %s1576_s2, 256 }
0x1636   :  { %p1307_p1 = scmp.ne.s32.totalorder %s1576_s2, %s1306_s12  ;;  %p1310_p2 = scmp.lt.u32.totalorder %s1306_s12, %s1576_s2 }
0x1638   :  { %p1312_p3 = pnand %p1310_p2, %p1307_p1 }
0x163a   :  { %1315 = shalt.err (!%p1312_p3)
}
0x163b   :  { %924 = dma.vmem_to_hbm [thread:$0]  %s1518_s20, 256, %s1576_s2, [#allocation6], %s1347_s25, %s1347_s25, %s1348_s26  }
0x163c   :  { %s1316_s16 = scalar_lea.vmem %s1523_s22, 32  ;;  %p1321_p5 = scmp.lt.s32.totalorder %s1523_s22, %s1523_s22 }
0x163d   :  { %p1317_p4 = scmp.ne.s32.totalorder %s1523_s22, %s1316_s16  ;;  %p1322_p6 = scmp.lt.s32.totalorder %s1316_s16, %s1316_s16 }
0x163f   :  { %p1323_p7 = por %p1322_p6, %p1321_p5 }
0x1641   :  { %p1324_p8 = pnand %p1323_p7, %p1317_p4 }
0x1643   :  { %1327 = shalt.err (!%p1324_p8)
}
0x1644   :  { %s1328_s19 = scalar_lea.hbm %s1578_s4, 32 }
0x1645   :  { %p1329_p9 = scmp.ne.s32.totalorder %s1578_s4, %s1328_s19  ;;  %p1332_p10 = scmp.lt.u32.totalorder %s1328_s19, %s1578_s4 }
0x1647   :  { %p1334_p11 = pnand %p1332_p10, %p1329_p9 }
0x1649   :  { %1337 = shalt.err (!%p1334_p11)
}
0x164a   :  { %944 = dma.vmem_to_hbm [thread:$0]  %s1523_s22, 32, %s1578_s4, [#allocation11]  }
0x164b   :  { %1342 = dma.done.wait [#allocation6], 256  }
0x164c   :  { %1343 = vsyncadd [#allocation6], 4294967040 }
0x164d   :  { %1344 = dma.done.wait [#allocation11], 64  }
0x164e   :  { %1345 = vsyncadd [#allocation11], 4294967232 }
0x164f   :  { %954 = vsyncpa [#allocation5], 1 }
0x1650   :  { %955 = vsyncpa [#allocation8], 1 }
0x1651   :  { %956 = vsyncpa [#allocation6], 1 }
0x1652   :  { %957 = vsyncpa [#allocation11], 1 }

</bundles_post_ra>
